<compile_context>
chip_gen: v5e
topology: v5e:2x2
jax: 0.10.0
libtpu: 0.0.40
codegen_flags: <defaults>
</compile_context>

<pallas_src>
from functools import partial

import numpy as np
import jax
import jax.numpy as jnp
from jax.experimental import pallas as pl
from jax.experimental.pallas import tpu as pltpu


# --------------------------- roll-convention probe ---------------------------

_ROLL_SIGN = None


def _roll_sign():
    """One-time on-device probe of pltpu.roll's shift convention (vs np.roll)
    so the conv shifts are correct under either convention.  Cached; must be
    resolved outside of any jit trace (done eagerly in __main__)."""
    global _ROLL_SIGN
    if _ROLL_SIGN is None:
        def k(x_ref, o_ref):
            o_ref[...] = pltpu.roll(x_ref[...], 17, axis=1)

        v = np.arange(256, dtype=np.float32)
        x = jnp.tile(jnp.asarray(v)[None, :], (8, 1))
        out = np.asarray(
            pl.pallas_call(k, out_shape=jax.ShapeDtypeStruct((8, 256),
                                                             jnp.float32))(x))[0]
        _ROLL_SIGN = -1 if np.array_equal(out, np.roll(v, -17)) else 1
    return _ROLL_SIGN


# ------------------------------- fused kernel --------------------------------

def gsc_fused_kernel(x_ref, w1t_ref, w2t_ref, b1_ref, b2_ref,
                     gamma_ref, beta_ref, o_ref, *, H, W, roll_sign):
    B, Cin, HW = x_ref.shape
    Cout = o_ref.shape[1]

    w1t = w1t_ref[...]                                  # [Cout, Cin]     bf16
    w2t = w2t_ref[...]                                  # [Cout, 9*Cout]  bf16
    b1 = b1_ref[...]                                    # [Cout, 1]       f32
    b2 = b2_ref[...]                                    # [Cout, 1]       f32

    # Border-validity masks for the nine 3x3 taps (padding=1 semantics),
    # hoisted out of the batch loop.  Lane p <-> pixel (y, x) = (p//W, p%W).
    lane = jax.lax.broadcasted_iota(jnp.int32, (1, HW), 1)
    xx = lane % W
    yy = lane // W
    taps = [(ky - 1, kx - 1) for ky in range(3) for kx in range(3)]
    masks = []
    for dy, dx in taps:
        valid = ((xx + dx >= 0) & (xx + dx < W) &
                 (yy + dy >= 0) & (yy + dy < H))
        masks.append(valid.astype(jnp.float32))          # [1, HW]

    x_bf16 = x_ref[...].astype(jnp.bfloat16)             # [B, Cin, HW]

    z_per_batch = []
    for b in range(B):                                   # B small & static
        # ---- grouped 1x1 conv: block-diagonal [Cout,Cin] @ [Cin,HW] (MXU) --
        xb = x_bf16[b]                                   # [Cin, HW]
        y1 = jnp.dot(w1t, xb, preferred_element_type=jnp.float32) + b1

        # ---- grouped 3x3 conv (padding=1) as ONE K = 9*Cout matmul ---------
        # Spatial shifts = lane rotations (XLU) + border masks.  Any
        # wraparound lands exactly on masked (padding) positions.
        slabs = []
        for t, (dy, dx) in enumerate(taps):
            d = dy * W + dx                              # flattened shift
            if d == 0:
                slabs.append(y1)
            else:
                sl = pltpu.roll(y1, (-d * roll_sign) % HW, axis=1)
                slabs.append(sl * masks[t])
        big = jnp.concatenate(slabs, axis=0).astype(jnp.bfloat16)  # [9C, HW]
        z = jnp.dot(w2t, big, preferred_element_type=jnp.float32) + b2
        z_per_batch.append(z)                            # [Cout, HW] f32

    z = jnp.stack(z_per_batch, axis=0)                   # [B, Cout, HW]

    # ---- BatchNorm2d (training-mode batch stats, biased var) + ReLU --------
    n = B * HW
    mean = jnp.sum(z, axis=(0, 2), keepdims=True) / n    # [1, Cout, 1]
    var = jnp.sum((z - mean) ** 2, axis=(0, 2), keepdims=True) / n
    scale = gamma_ref[...][None] * jax.lax.rsqrt(var + 1e-5)
    shift = beta_ref[...][None] - mean * scale
    o_ref[...] = jnp.maximum(z * scale + shift, 0.0)     # lane-dense store


# --------------------------------- wrapper -----------------------------------

def gsc_forward(x_nchw, params):
    """GSC forward.  x_nchw: [B, Cin, H, W] float32 (PyTorch layout)."""
    B, Cin, H, W = x_nchw.shape
    HW = H * W
    Cout = params["w1t"].shape[0]

    x = x_nchw.reshape(B, Cin, HW)          # free view of NCHW (no transpose)

    out = pl.pallas_call(
        partial(gsc_fused_kernel, H=H, W=W, roll_sign=_roll_sign()),
        out_shape=jax.ShapeDtypeStruct((B, Cout, HW), jnp.float32),
        grid=(1,),
        in_specs=[
            pl.BlockSpec((B, Cin, HW), lambda i: (0, 0, 0)),
            pl.BlockSpec((Cout, Cin), lambda i: (0, 0)),
            pl.BlockSpec((Cout, 9 * Cout), lambda i: (0, 0)),
            pl.BlockSpec((Cout, 1), lambda i: (0, 0)),
            pl.BlockSpec((Cout, 1), lambda i: (0, 0)),
            pl.BlockSpec((Cout, 1), lambda i: (0, 0)),
            pl.BlockSpec((Cout, 1), lambda i: (0, 0)),
        ],
        out_specs=pl.BlockSpec((B, Cout, HW), lambda i: (0, 0, 0)),
        compiler_params=pltpu.CompilerParams(
            dimension_semantics=("arbitrary",)),
    )(x, params["w1t"], params["w2t"], params["b1"], params["b2"],
      params["gamma"], params["beta"])

    return out.reshape(B, Cout, H, W)       # free view back to NCHW


# -------------------------- parameter construction ---------------------------

def build_params(w1, b1, w2, b2, gamma, beta, groups):
    """Pack PyTorch-layout grouped-conv weights into the dense block-diagonal
    'W @ x' matrices used by the fused kernel (bf16 for the MXU)."""
    w1 = np.asarray(w1, np.float32)          # [Cout, Cin//G, 1, 1]
    w2 = np.asarray(w2, np.float32)          # [Cout, Cout//G, 3, 3]
    Cout, cig, _, _ = w1.shape
    Cin = cig * groups
    cog = Cout // groups

    # grouped 1x1 conv -> block-diagonal [Cout, Cin]
    w1t = np.zeros((Cout, Cin), np.float32)
    for g in range(groups):
        w1t[g * cog:(g + 1) * cog, g * cig:(g + 1) * cig] = \
            w1[g * cog:(g + 1) * cog, :, 0, 0]

    # grouped 3x3 conv -> [Cout, 9*Cout]; column block t corresponds to tap t
    w2t = np.zeros((Cout, 9 * Cout), np.float32)
    for t in range(9):
        ky, kx = divmod(t, 3)
        for g in range(groups):
            w2t[g * cog:(g + 1) * cog,
                t * Cout + g * cog: t * Cout + (g + 1) * cog] = \
                w2[g * cog:(g + 1) * cog, :, ky, kx]

    def col(v):
        return jnp.asarray(np.asarray(v, np.float32).reshape(-1, 1))

    return {
        "w1t": jnp.asarray(w1t, jnp.bfloat16),
        "w2t": jnp.asarray(w2t, jnp.bfloat16),
        "b1": col(b1), "b2": col(b2), "gamma": col(gamma), "beta": col(beta),
    }


# ----------------------------- pure-JAX reference ----------------------------

def gsc_reference(x_nchw, w1, b1, w2, b2, gamma, beta, groups):
    dn = ("NCHW", "OIHW", "NCHW")
    y = jax.lax.conv_general_dilated(x_nchw, w1, (1, 1), "VALID",
                                     dimension_numbers=dn,
                                     feature_group_count=groups)
    y = y + b1[None, :, None, None]
    y = jax.lax.conv_general_dilated(y, w2, (1, 1), ((1, 1), (1, 1)),
                                     dimension_numbers=dn,
                                     feature_group_count=groups)
    y = y + b2[None, :, None, None]
    mean = jnp.mean(y, axis=(0, 2, 3), keepdims=True)
    var = jnp.mean((y - mean) ** 2, axis=(0, 2, 3), keepdims=True)
    y = ((y - mean) * jax.lax.rsqrt(var + 1e-5)
         * gamma[None, :, None, None] + beta[None, :, None, None])
    return jnp.maximum(y, 0.0)


# ----------------------------------- main -------------------------------------

if __name__ == "__main__":
    B, Cin, Cout, H, W, G = 2, 16, 32, 16, 16, 8

    key = jax.random.PRNGKey(0)
    k = jax.random.split(key, 7)
    w1 = 0.2 * jax.random.normal(k[0], (Cout, Cin // G, 1, 1), jnp.float32)
    b1 = 0.1 * jax.random.normal(k[1], (Cout,), jnp.float32)
    w2 = 0.2 * jax.random.normal(k[2], (Cout, Cout // G, 3, 3), jnp.float32)
    b2 = 0.1 * jax.random.normal(k[3], (Cout,), jnp.float32)
    gamma = 1.0 + 0.1 * jax.random.normal(k[4], (Cout,), jnp.float32)
    beta = 0.1 * jax.random.normal(k[5], (Cout,), jnp.float32)
    x = jax.random.normal(k[6], (B, Cin, H, W), jnp.float32)   # NCHW input

    _roll_sign()                     # resolve roll convention once, eagerly
    params = build_params(w1, b1, w2, b2, gamma, beta, G)
    out = jax.block_until_ready(gsc_forward(x, params))

    ref = gsc_reference(x, w1, b1, w2, b2, gamma, beta, G)
    assert out.shape == (B, Cout, H, W), out.shape
    max_err = float(jnp.max(jnp.abs(out - ref)))
    # bf16 matmul operands (f32 accumulation) vs f32 reference -> small
    # rounding differences; structural bugs would be O(1).
    assert max_err < 1e-1, max_err

    print("KERNEL_OK")
</pallas_src>

<mosaic_0001>
module attributes {stable_mosaic.version = 11 : i64} {
  func.func @k(%arg0: memref<8x256xf32, #tpu.memory_space<vmem>>, %arg1: memref<8x256xf32, #tpu.memory_space<vmem>>) attributes {dimension_semantics = [], scalar_prefetch = 0 : i64, scratch_operands = 0 : i64, tpu.core_type = #tpu.core_type<tc>} {
    %c0 = arith.constant 0 : index
    %c0_0 = arith.constant 0 : index
    %0 = vector.load %arg0[%c0, %c0_0] : memref<8x256xf32, #tpu.memory_space<vmem>>, vector<8x256xf32>
    %c17_i32 = arith.constant 17 : i32
    %1 = tpu.dynamic_rotate %0 by %c17_i32 dim 1 : vector<8x256xf32>, i32 -> vector<8x256xf32>
    %c0_1 = arith.constant 0 : index
    %c0_2 = arith.constant 0 : index
    %2 = vector.load %arg1[%c0_1, %c0_2] : memref<8x256xf32, #tpu.memory_space<vmem>>, vector<8x256xf32>
    tpu.vector_store %arg1[%c0_1, %c0_2], %1 {strides = array<i32>} : memref<8x256xf32, #tpu.memory_space<vmem>>, vector<8x256xf32>,
    return
  }
}

</mosaic_0001>

<bundles_post_ra>
// kernel: tpu_custom_call.1
= control target key start
LH: loop header
LB: loop body
LE: loop exit
PB: predicated region body
PF: predicated region fallthrough
CT: control target
= control target key end

     0   :  { %6 = vsyncpa [#allocation3], 0  ;;  %s127_s0 = inlined_call_operand.hbm [shape: f32[8,256], index: 0, kind: input, shape index: {}]   ;;  %s128_s1 = inlined_call_operand.hbm [shape: f32[8,256], index: 1, kind: output, shape index: {}]  }
   0x1   :  { %7 = vsyncpa [#allocation4], 0  ;;  %s13_s8 = sshll.u32 %s127_s0, 4  ;;  %s108_s9 = smov [#allocation2]   ;;  %s14_s8 = int_to_ptr.hbm [resolvable:$true] %s13_s8 }
   0x2   :  { %s15_s10 = sshll.u32 %s108_s9, 4  ;;  %s16_s10 = int_to_ptr.vmem [resolvable:$true] %s15_s10 }
   0x3   :  { %18 = dma.hbm_to_vmem [thread:$0]  %s14_s8, 256, %s16_s10, [#allocation3]  }
   0x4   :  { %104 = dma.done.wait [#allocation3], 256  }
   0x5   :  { %105 = vsyncadd [#allocation3], 4294967040  ;;  %v23_v0 = vld [vmem:[#allocation2] sm:$0xff]  ;;  %s109_s11 = smov 17   ;;  %v24_v1 = vld [vmem:[#allocation2 + $0x8] sm:$0xff]  ;;  %v29_v2 = vlaneseq  ;;  %s110_s12 = smov [#allocation5]  }
   0x6   :  { %25 = vrot.lane.b32.xlu0 %v23_v0, %s109_s11  ;;  %s41_s13 = sshll.u32 %s110_s12, 4  ;;  %s43_s15 = sshll.u32 %s128_s1, 4  ;;  %s42_s13 = int_to_ptr.vmem [resolvable:$true] %s41_s13  ;;  %s44_s15 = int_to_ptr.hbm [resolvable:$true] %s43_s15 }
   0x7   :  { %v30_v4 = vand.u32 127, %v29_v2 }
   0x9   :  { %vm31_vm0 = vcmp.lt.s32.totalorder %v30_v4, 17 }
   0xe   :  { %27 = vrot.lane.b32.xlu0 %v24_v1, %s109_s11 }
  0x78   :  { %v26_v3 = vpop.permute.xlu0 %25 }
  0x80   :  { %v28_v5 = vpop.permute.xlu0 %27 }
  0x81   :  { %v32_v6 = vsel %vm31_vm0, %v26_v3, %v28_v5  ;;  %v33_v7 = vsel %vm31_vm0, %v28_v5, %v26_v3 }
  0x82   :  { %34 = vst [vmem:[#allocation5] sm:$0xff] %v33_v7 }
  0x83   :  { %35 = vst [vmem:[#allocation5 + $0x8] sm:$0xff] %v32_v6 }
  0x84   :  { %46 = dma.vmem_to_hbm [thread:$0]  %s42_s13, 256, %s44_s15, [#allocation4]  }
  0x85   :  { %106 = dma.done.wait [#allocation4], 256  }
  0x86   :  { %107 = vsyncadd [#allocation4], 4294967040 }
  0x87   :  { %51 = vsyncpa [#allocation3], 1 }
  0x88   :  { %52 = vsyncpa [#allocation4], 1 }

</bundles_post_ra>
